<compile_context>
chip_gen: v7x
topology: tpu7x:2x2x1
jax: 0.10.0
libtpu: 0.0.40
codegen_flags: <defaults>
</compile_context>

<pallas_src>
import functools

import jax
import jax.numpy as jnp
from jax.experimental import pallas as pl
from jax.experimental.pallas import tpu as pltpu

D_MODEL = 32
VOCAB = 128


def _cdiv(a, b):
    return -(-a // b)


# ------------------------- fused forward kernel ----------------------------
def _fused_fwd_kernel(valid_ref, enc_ref, emb_ref, wc_ref, bc_ref, wo_ref,
                      bo_ref, o_ref, *, apply_log_softmax):
    # valid_ref : VMEM (Bt, 1)        int32  (# valid encoder positions / row)
    # enc_ref   : VMEM (Bt, Senc, D)  bf16   (raw encoder input tile)
    # emb_ref   : VMEM (Bt*Sdec, D)   bf16   (decoder token embeddings, 2-D)
    # wc_ref    : VMEM (D, V) bf16           (W_enc @ W_out, combined)
    # bc_ref    : VMEM (1, V) f32            (b_enc @ W_out)
    # wo_ref    : VMEM (D, V) bf16
    # bo_ref    : VMEM (1, V) f32
    # o_ref     : VMEM (Bt, Sdec, V)  bf16
    Bt, Senc, D = enc_ref.shape
    Sdec = o_ref.shape[1]
    V = o_ref.shape[2]

    # ---- masked mean-pool over the encoder sequence (vectorized over Bt) ---
    valid = valid_ref[...]                                          # (Bt,1) i32
    denom = jnp.maximum(valid.astype(jnp.float32), 1.0)             # (Bt,1)
    ind = (valid > 0).astype(jnp.float32)                           # (Bt,1)
    seq = jax.lax.broadcasted_iota(jnp.int32, (Bt, Senc, 1), 1)
    mask = seq < valid[:, None, :]                                  # (Bt,Senc,1)
    x = enc_ref[...].astype(jnp.float32)                            # f32 pool
    pooled_raw = jnp.sum(jnp.where(mask, x, 0.0), axis=1) / denom   # (Bt,D)

    # ---- pooled cross features routed straight to vocab space -------------
    # pool(X@We+be)@Wo == pool(X)@(We@Wo) + (be@Wo)*1[valid>0]  (linear enc.)
    cross_v = (jnp.dot(pooled_raw.astype(jnp.bfloat16), wc_ref[...],
                       preferred_element_type=jnp.float32)
               + bc_ref[...] * ind)                                 # (Bt,V) f32

    # ---- decoder: embedding @ W_out + pooled cross + bias (big MXU op) ----
    logits2d = jnp.dot(emb_ref[...], wo_ref[...],
                       preferred_element_type=jnp.float32)          # (Bt*Sdec,V)
    logits = (logits2d.reshape(Bt, Sdec, V)                         # lane-dense
              + cross_v[:, None, :]
              + bo_ref[...][None])                                  # (Bt,Sdec,V)

    if apply_log_softmax:                        # f32 epilogue (v5e-friendly)
        mx = jnp.max(logits, axis=-1, keepdims=True)
        lse = jnp.log(jnp.sum(jnp.exp(logits - mx), axis=-1,
                              keepdims=True)) + mx
        logits = logits - lse

    o_ref[...] = logits.astype(o_ref.dtype)                         # bf16 store


# ------------------------- tiling / padding plan ---------------------------
def _plan_batch_tile(B, Senc, Sdec, D, V, target_rows=1024, max_tile=512,
                     vmem_budget_bytes=20 << 20):
    """Pick (Bt, B_padded).

    * Bt*Sdec ~ target_rows MXU rows per grid step (amortizes ~0.35us/step
      grid overhead), capped so the double-buffered bf16 in/out footprint fits
      `vmem_budget_bytes` (conservative for v7x's 64 MiB physical VMEM).
    * Bt is a multiple of 8 (sublane tile) unless one tile covers the batch.
    * B is padded up to a multiple of Bt — never shrink Bt to divide B.
    * For B > 8 we force >= 2 grid steps so both v7x TensorCores get work.
    """
    rup8 = lambda v: _cdiv(v, 8) * 8
    bt = min(max_tile, max(8, rup8(_cdiv(target_rows, max(Sdec, 1)))))
    per_row_bytes = 2 * 2 * (Senc * D + Sdec * D + Sdec * V) + 2 * 4
    bt_cap = max(8, (vmem_budget_bytes // max(per_row_bytes, 1)) // 8 * 8)
    bt = min(bt, bt_cap)
    if B <= 8:
        return B, B                       # single tile == full (tiny) batch
    bt = min(bt, rup8(_cdiv(B, 2)))       # keep >= 2 grid steps (v7x megacore)
    return bt, _cdiv(B, bt) * bt


def fused_caption_forward(enc_x_bf16, dec_emb_bf16, valid_i32, w_comb_bf16,
                          b_comb, w_out_bf16, b_out, apply_log_softmax):
    B, Senc, D = enc_x_bf16.shape
    Sdec = dec_emb_bf16.shape[1]
    V = w_out_bf16.shape[1]
    Bt, B_pad = _plan_batch_tile(B, Senc, Sdec, D, V)

    if B_pad != B:                        # pad instead of shrinking the tile
        pad = B_pad - B
        enc_x_bf16 = jnp.pad(enc_x_bf16, ((0, pad), (0, 0), (0, 0)))
        dec_emb_bf16 = jnp.pad(dec_emb_bf16, ((0, pad), (0, 0), (0, 0)))
        valid_i32 = jnp.pad(valid_i32, ((0, pad), (0, 0)))  # valid=0 rows
    # lane-contiguous 2-D slab for the decoder MXU operand (free XLA reshape)
    dec_emb_2d = dec_emb_bf16.reshape(B_pad * Sdec, D)
    grid = B_pad // Bt

    # scoped-VMEM limit from the real double-buffered per-step footprint
    step_bytes = (2 * (Bt * Senc * D * 2 + Bt * Sdec * D * 2
                       + Bt * Sdec * V * 2 + Bt * 4)
                  + 2 * (2 * D * V * 2 + 2 * V * 4))
    vmem_limit = int(min(48 << 20, max(32 << 20, 2 * step_bytes)))

    kernel = functools.partial(_fused_fwd_kernel,
                               apply_log_softmax=bool(apply_log_softmax))
    grid_spec = pltpu.PrefetchScalarGridSpec(
        num_scalar_prefetch=0,
        grid=(grid,),
        in_specs=[
            pl.BlockSpec((Bt, 1), lambda i: (i, 0)),          # valid counts
            pl.BlockSpec((Bt, Senc, D), lambda i: (i, 0, 0)),  # enc_x (bf16)
            pl.BlockSpec((Bt * Sdec, D), lambda i: (i, 0)),    # dec emb (bf16)
            pl.BlockSpec((D, V), lambda i: (0, 0)),            # W_comb
            pl.BlockSpec((1, V), lambda i: (0, 0)),            # b_comb
            pl.BlockSpec((D, V), lambda i: (0, 0)),            # W_out
            pl.BlockSpec((1, V), lambda i: (0, 0)),            # b_out
        ],
        out_specs=pl.BlockSpec((Bt, Sdec, V), lambda i: (i, 0, 0)),
    )
    out = pl.pallas_call(
        kernel,
        out_shape=jax.ShapeDtypeStruct((B_pad, Sdec, V), jnp.bfloat16),
        grid_spec=grid_spec,
        compiler_params=pltpu.CompilerParams(
            dimension_semantics=("parallel",),       # shards over v7x's 2 TCs
            vmem_limit_bytes=vmem_limit),
    )(valid_i32, enc_x_bf16, dec_emb_2d, w_comb_bf16, b_comb,
      w_out_bf16, b_out)
    return out[:B] if B_pad != B else out


# ------------------------------ model wrapper ------------------------------
class CaptioningModelPallas:
    def __init__(self, key, d_model=D_MODEL, vocab=VOCAB):
        k1, k2, k3, k4, k5 = jax.random.split(key, 5)
        s = 0.02
        w_enc = jax.random.normal(k1, (d_model, d_model), jnp.float32) * s
        w_out = jax.random.normal(k4, (d_model, vocab), jnp.float32) * s
        embed = jax.random.normal(k3, (vocab, d_model), jnp.float32) * s
        self.b_enc = (jax.random.normal(k2, (d_model,), jnp.float32) * s
                      ).reshape(1, d_model)
        self.b_out = (jax.random.normal(k5, (vocab,), jnp.float32) * s
                      ).reshape(1, vocab)

        # bf16 MXU copies (made once; no per-call casts of weights)
        self.w_enc_bf16 = w_enc.astype(jnp.bfloat16)
        self.w_out_bf16 = w_out.astype(jnp.bfloat16)
        self.embed = embed                               # f32 (reference path)
        self.embed_bf16 = embed.astype(jnp.bfloat16)     # bf16 (fused path)

        # combined weights: pool(X@We+be)@Wo == pool(X)@(We@Wo) + (be@Wo)*ind
        we_f32 = self.w_enc_bf16.astype(jnp.float32)
        wo_f32 = self.w_out_bf16.astype(jnp.float32)
        self.w_comb_bf16 = (we_f32 @ wo_f32).astype(jnp.bfloat16)   # (D, V)
        self.b_comb = self.b_enc @ wo_f32                            # (1, V) f32

        self.d_model = d_model
        self.vocab = vocab
        self.rank = 0  # mirrors the PyTorch attribute (device group id)

    def check_required_attributes(self):
        if self.rank is None:
            raise NotImplementedError(
                "Subclass must assign the rank integer according to the GPU group")

    # ---- reference (plain-JAX) stages; forward() uses the fused kernel ----
    def forward_enc(self, enc_input, enc_input_num_pads):
        w = self.w_enc_bf16.astype(jnp.float32)
        return jnp.einsum('bsd,de->bse', enc_input, w,
                          precision=jax.lax.Precision.HIGHEST) + self.b_enc

    def forward_dec(self, cross_input, enc_input_num_pads, dec_input,
                    dec_input_num_pads, apply_log_softmax=False):
        # TODO(synk): dec_input_num_pads is unused by this toy decoder (the
        # decoder output depends only on each token's own embedding).
        B, Senc, D = cross_input.shape
        num_pads = jnp.asarray(enc_input_num_pads, jnp.int32)
        valid = Senc - num_pads
        mask = (jnp.arange(Senc, dtype=jnp.int32)[None, :] < valid[:, None]
                ).astype(jnp.float32)[..., None]                  # (B,Senc,1)
        denom = jnp.maximum(jnp.sum(mask, axis=1), 1.0)           # (B,1)
        pooled = jnp.sum(cross_input * mask, axis=1) / denom      # (B,D)
        h = self.embed[dec_input] + pooled[:, None, :]
        w = self.w_out_bf16.astype(jnp.float32)
        logits = jnp.einsum('bsd,dv->bsv', h, w,
                            precision=jax.lax.Precision.HIGHEST) + self.b_out
        if apply_log_softmax:
            logits = jax.nn.log_softmax(logits, axis=-1)
        return logits

    # ---- fused Pallas hot path (mode='forward') ----------------------------
    def _fused_forward(self, enc_x, dec_x, enc_x_num_pads, dec_x_num_pads,
                       apply_log_softmax):
        Senc = enc_x.shape[1]
        num_pads = jnp.asarray(enc_x_num_pads, jnp.int32)             # (B,)
        valid = (Senc - num_pads).astype(jnp.int32).reshape(-1, 1)     # (B,1)
        dec_emb = self.embed_bf16[dec_x]      # bf16 embedding gather (glue op)
        return fused_caption_forward(enc_x.astype(jnp.bfloat16), dec_emb,
                                     valid, self.w_comb_bf16, self.b_comb,
                                     self.w_out_bf16, self.b_out,
                                     apply_log_softmax)

    # same control flow as CaptioningModel.forward (mode='forward' path)
    def forward(self, enc_x, dec_x=None, enc_x_num_pads=[0], dec_x_num_pads=[0],
                apply_log_softmax=False, mode='forward', **kwargs):
        if mode == 'forward':
            return self._fused_forward(enc_x, dec_x, enc_x_num_pads,
                                       dec_x_num_pads, apply_log_softmax)
        # TODO(synk): beam_search / sampling / max modes are host-side
        # autoregressive loops producing ragged Python-list outputs; no clean
        # single-Pallas-kernel equivalent, so only mode='forward' is kerneled.
        raise NotImplementedError(
            "Only mode='forward' is implemented in the Pallas port")


if __name__ == "__main__":
    key = jax.random.PRNGKey(0)
    kp, kx, kd, kx2, kd2 = jax.random.split(key, 5)
    model = CaptioningModelPallas(kp)

    # ---- small-shape smoke test (single grid step, full-batch tile) -------
    B, SENC, SDEC = 2, 8, 8
    enc_x = jax.random.normal(kx, (B, SENC, D_MODEL), jnp.float32)
    dec_x = jax.random.randint(kd, (B, SDEC), 0, VOCAB, dtype=jnp.int32)
    enc_pads = [0, 2]

    y = model.forward(enc_x, dec_x, enc_x_num_pads=enc_pads,
                      dec_x_num_pads=[0, 0], apply_log_softmax=True,
                      mode='forward')
    jax.block_until_ready(y)
    assert y.shape == (B, SDEC, VOCAB), y.shape
    assert y.dtype == jnp.bfloat16

    y_f32 = y.astype(jnp.float32)
    row_sums = jnp.exp(y_f32).sum(-1)          # log-softmax rows sum to ~1
    assert bool(jnp.all(jnp.abs(row_sums - 1.0) < 2e-2)), row_sums

    y_ref = model.forward_dec(model.forward_enc(enc_x, enc_pads), enc_pads,
                              dec_x, [0, 0], apply_log_softmax=True)
    max_err = float(jnp.max(jnp.abs(y_f32 - y_ref)))
    assert max_err < 5e-2, f"fused vs reference mismatch: {max_err}"

    # raw-logits path also exercised
    y2 = model.forward(enc_x, dec_x, enc_x_num_pads=enc_pads,
                       dec_x_num_pads=[0, 0], apply_log_softmax=False,
                       mode='forward')
    jax.block_until_ready(y2)
    assert y2.shape == (B, SDEC, VOCAB)
    y2_ref = model.forward_dec(model.forward_enc(enc_x, enc_pads), enc_pads,
                               dec_x, [0, 0], apply_log_softmax=False)
    assert float(jnp.max(jnp.abs(y2.astype(jnp.float32) - y2_ref))) < 1e-2

    # ---- batch that does NOT divide the tile: exercises padding, a 2-step
    # ---- parallel grid (both v7x TCs) and an all-padded encoder row -------
    B2, SENC2 = 20, 16
    enc_x2 = jax.random.normal(kx2, (B2, SENC2, D_MODEL), jnp.float32)
    dec_x2 = jax.random.randint(kd2, (B2, SDEC), 0, VOCAB, dtype=jnp.int32)
    enc_pads2 = [i % (SENC2 + 1) for i in range(B2)]   # includes all-pad row
    y3 = model.forward(enc_x2, dec_x2, enc_x_num_pads=enc_pads2,
                       dec_x_num_pads=[0] * B2, apply_log_softmax=True,
                       mode='forward')
    jax.block_until_ready(y3)
    assert y3.shape == (B2, SDEC, VOCAB)
    y3_ref = model.forward_dec(model.forward_enc(enc_x2, enc_pads2), enc_pads2,
                               dec_x2, [0] * B2, apply_log_softmax=True)
    max_err3 = float(jnp.max(jnp.abs(y3.astype(jnp.float32) - y3_ref)))
    assert max_err3 < 5e-2, f"padded-grid mismatch: {max_err3}"

    print("KERNEL_OK")
</pallas_src>

<mosaic_0001>
module attributes {stable_mosaic.version = 11 : i64} {
  func.func @_fused_fwd_kernel(%arg0: i32, %arg1: memref<2x1xi32, #tpu.memory_space<vmem>>, %arg2: memref<2x8x32xbf16, #tpu.memory_space<vmem>>, %arg3: memref<16x32xbf16, #tpu.memory_space<vmem>>, %arg4: memref<32x128xbf16, #tpu.memory_space<vmem>>, %arg5: memref<1x128xf32, #tpu.memory_space<vmem>>, %arg6: memref<32x128xbf16, #tpu.memory_space<vmem>>, %arg7: memref<1x128xf32, #tpu.memory_space<vmem>>, %arg8: memref<2x8x128xbf16, #tpu.memory_space<vmem>>) attributes {dimension_semantics = [#tpu.dimension_semantics<parallel>], iteration_bounds = array<i64: 1>, scalar_prefetch = 0 : i64, scratch_operands = 0 : i64, tpu.core_type = #tpu.core_type<tc>, window_params = [{transform_indices = @transform_0, window_bounds = array<i64: 2, 1>}, {transform_indices = @transform_1, window_bounds = array<i64: 2, 8, 32>}, {transform_indices = @transform_2, window_bounds = array<i64: 16, 32>}, {pipeline_mode = #tpu.pipeline_mode<synchronous>, transform_indices = @transform_3, window_bounds = array<i64: 32, 128>}, {pipeline_mode = #tpu.pipeline_mode<synchronous>, transform_indices = @transform_4, window_bounds = array<i64: 1, 128>}, {pipeline_mode = #tpu.pipeline_mode<synchronous>, transform_indices = @transform_5, window_bounds = array<i64: 32, 128>}, {pipeline_mode = #tpu.pipeline_mode<synchronous>, transform_indices = @transform_6, window_bounds = array<i64: 1, 128>}, {transform_indices = @transform_7, window_bounds = array<i64: 2, 8, 128>}]} {
    %c0 = arith.constant 0 : index
    %c0_0 = arith.constant 0 : index
    %0 = vector.load %arg1[%c0, %c0_0] : memref<2x1xi32, #tpu.memory_space<vmem>>, vector<2x1xi32>
    %1 = arith.sitofp %0 : vector<2x1xi32> to vector<2x1xf32>
    %cst = arith.constant 1.000000e+00 : f32
    %2 = vector.broadcast %cst : f32 to vector<2x1xf32>
    %3 = arith.maximumf %1, %2 : vector<2x1xf32>
    %c0_i32 = arith.constant 0 : i32
    %4 = vector.broadcast %c0_i32 : i32 to vector<2x1xi32>
    %5 = arith.cmpi sgt, %0, %4 : vector<2x1xi32>
    %6 = arith.extui %5 : vector<2x1xi1> to vector<2x1xi32>
    %7 = arith.sitofp %6 : vector<2x1xi32> to vector<2x1xf32>
    %8 = tpu.iota {dimensions = array<i32: 1>} : vector<2x8x1xi32>
    %9 = vector.shape_cast %0 : vector<2x1xi32> to vector<2x1x1xi32>
    %10 = vector.broadcast %9 : vector<2x1x1xi32> to vector<2x8x1xi32>
    %11 = arith.cmpi slt, %8, %10 : vector<2x8x1xi32>
    %c0_1 = arith.constant 0 : index
    %c0_2 = arith.constant 0 : index
    %c0_3 = arith.constant 0 : index
    %12 = vector.load %arg2[%c0_1, %c0_2, %c0_3] : memref<2x8x32xbf16, #tpu.memory_space<vmem>>, vector<2x8x32xbf16>
    %13 = arith.extf %12 : vector<2x8x32xbf16> to vector<2x8x32xf32>
    %cst_4 = arith.constant 0.000000e+00 : f32
    %14 = vector.shape_cast %11 : vector<2x8x1xi1> to vector<2x8x1xi1>
    %15 = vector.broadcast %14 : vector<2x8x1xi1> to vector<2x8x32xi1>
    %16 = vector.broadcast %cst_4 : f32 to vector<2x8x32xf32>
    %17 = arith.select %15, %13, %16 : vector<2x8x32xi1>, vector<2x8x32xf32>
    %cst_5 = arith.constant dense<0.000000e+00> : vector<2x32xf32>
    %18 = vector.multi_reduction <add>, %17, %cst_5 [1] : vector<2x8x32xf32> to vector<2x32xf32>
    %19 = vector.broadcast %3 : vector<2x1xf32> to vector<2x32xf32>
    %20 = arith.divf %18, %19 : vector<2x32xf32>
    %21 = arith.truncf %20 : vector<2x32xf32> to vector<2x32xbf16>
    %c0_6 = arith.constant 0 : index
    %c0_7 = arith.constant 0 : index
    %22 = vector.load %arg4[%c0_6, %c0_7] : memref<32x128xbf16, #tpu.memory_space<vmem>>, vector<32x128xbf16>
    %cst_8 = arith.constant dense<0.000000e+00> : vector<2x128xf32>
    %23 = tpu.matmul %21, %22, %cst_8 {dimension_numbers = #tpu.dot_dimension_numbers<[1], [0], [0], [1], [0, 0, 1, 1], [], []>} : vector<2x32xbf16>, vector<32x128xbf16>, vector<2x128xf32> -> vector<2x128xf32>
    %c0_9 = arith.constant 0 : index
    %c0_10 = arith.constant 0 : index
    %24 = vector.load %arg5[%c0_9, %c0_10] : memref<1x128xf32, #tpu.memory_space<vmem>>, vector<1x128xf32>
    %25 = vector.broadcast %24 : vector<1x128xf32> to vector<2x128xf32>
    %26 = vector.broadcast %7 : vector<2x1xf32> to vector<2x128xf32>
    %27 = arith.mulf %25, %26 : vector<2x128xf32>
    %28 = arith.addf %23, %27 : vector<2x128xf32>
    %c0_11 = arith.constant 0 : index
    %c0_12 = arith.constant 0 : index
    %29 = vector.load %arg3[%c0_11, %c0_12] : memref<16x32xbf16, #tpu.memory_space<vmem>>, vector<16x32xbf16>
    %c0_13 = arith.constant 0 : index
    %c0_14 = arith.constant 0 : index
    %30 = vector.load %arg6[%c0_13, %c0_14] : memref<32x128xbf16, #tpu.memory_space<vmem>>, vector<32x128xbf16>
    %cst_15 = arith.constant dense<0.000000e+00> : vector<16x128xf32>
    %31 = tpu.matmul %29, %30, %cst_15 {dimension_numbers = #tpu.dot_dimension_numbers<[1], [0], [0], [1], [0, 0, 1, 1], [], []>} : vector<16x32xbf16>, vector<32x128xbf16>, vector<16x128xf32> -> vector<16x128xf32>
    %32 = vector.shape_cast %31 : vector<16x128xf32> to vector<2x8x128xf32>
    %33 = vector.shape_cast %28 : vector<2x128xf32> to vector<2x1x128xf32>
    %34 = vector.broadcast %33 : vector<2x1x128xf32> to vector<2x8x128xf32>
    %35 = arith.addf %32, %34 : vector<2x8x128xf32>
    %c0_16 = arith.constant 0 : index
    %c0_17 = arith.constant 0 : index
    %36 = vector.load %arg7[%c0_16, %c0_17] : memref<1x128xf32, #tpu.memory_space<vmem>>, vector<1x128xf32>
    %37 = vector.shape_cast %36 : vector<1x128xf32> to vector<1x1x128xf32>
    %38 = vector.broadcast %37 : vector<1x1x128xf32> to vector<2x8x128xf32>
    %39 = arith.addf %35, %38 : vector<2x8x128xf32>
    %cst_18 = arith.constant dense<0xFF800000> : vector<2x8xf32>
    %40 = vector.multi_reduction <maximumf>, %39, %cst_18 [2] : vector<2x8x128xf32> to vector<2x8xf32>
    %41 = vector.shape_cast %40 : vector<2x8xf32> to vector<2x8x1xf32>
    %42 = vector.broadcast %41 : vector<2x8x1xf32> to vector<2x8x128xf32>
    %43 = arith.subf %39, %42 : vector<2x8x128xf32>
    %44 = math.exp %43 : vector<2x8x128xf32>
    %cst_19 = arith.constant dense<0.000000e+00> : vector<2x8xf32>
    %45 = vector.multi_reduction <add>, %44, %cst_19 [2] : vector<2x8x128xf32> to vector<2x8xf32>
    %46 = vector.shape_cast %45 : vector<2x8xf32> to vector<2x8x1xf32>
    %47 = math.log %46 : vector<2x8x1xf32>
    %48 = arith.addf %47, %41 : vector<2x8x1xf32>
    %49 = vector.broadcast %48 : vector<2x8x1xf32> to vector<2x8x128xf32>
    %50 = arith.subf %39, %49 : vector<2x8x128xf32>
    %51 = arith.truncf %50 : vector<2x8x128xf32> to vector<2x8x128xbf16>
    %c0_20 = arith.constant 0 : index
    %c0_21 = arith.constant 0 : index
    %c0_22 = arith.constant 0 : index
    %52 = vector.load %arg8[%c0_20, %c0_21, %c0_22] : memref<2x8x128xbf16, #tpu.memory_space<vmem>>, vector<2x8x128xbf16>
    tpu.vector_store %arg8[%c0_20, %c0_21, %c0_22], %51 {strides = array<i32>} : memref<2x8x128xbf16, #tpu.memory_space<vmem>>, vector<2x8x128xbf16>,
    return
  }
  func.func @transform_0(%arg0: i32) -> (i32, i32) {
    %c0_i32 = arith.constant 0 : i32
    %c0_i32_0 = arith.constant 0 : i32
    return %arg0, %c0_i32 : i32, i32
  }
  func.func @transform_1(%arg0: i32) -> (i32, i32, i32) {
    %c0_i32 = arith.constant 0 : i32
    %c0_i32_0 = arith.constant 0 : i32
    %c0_i32_1 = arith.constant 0 : i32
    return %arg0, %c0_i32, %c0_i32_0 : i32, i32, i32
  }
  func.func @transform_2(%arg0: i32) -> (i32, i32) {
    %c0_i32 = arith.constant 0 : i32
    %c0_i32_0 = arith.constant 0 : i32
    return %arg0, %c0_i32 : i32, i32
  }
  func.func @transform_3(%arg0: i32) -> (i32, i32) {
    %c0_i32 = arith.constant 0 : i32
    %c0_i32_0 = arith.constant 0 : i32
    %c0_i32_1 = arith.constant 0 : i32
    return %c0_i32, %c0_i32_0 : i32, i32
  }
  func.func @transform_4(%arg0: i32) -> (i32, i32) {
    %c0_i32 = arith.constant 0 : i32
    %c0_i32_0 = arith.constant 0 : i32
    %c0_i32_1 = arith.constant 0 : i32
    return %c0_i32, %c0_i32_0 : i32, i32
  }
  func.func @transform_5(%arg0: i32) -> (i32, i32) {
    %c0_i32 = arith.constant 0 : i32
    %c0_i32_0 = arith.constant 0 : i32
    %c0_i32_1 = arith.constant 0 : i32
    return %c0_i32, %c0_i32_0 : i32, i32
  }
  func.func @transform_6(%arg0: i32) -> (i32, i32) {
    %c0_i32 = arith.constant 0 : i32
    %c0_i32_0 = arith.constant 0 : i32
    %c0_i32_1 = arith.constant 0 : i32
    return %c0_i32, %c0_i32_0 : i32, i32
  }
  func.func @transform_7(%arg0: i32) -> (i32, i32, i32) {
    %c0_i32 = arith.constant 0 : i32
    %c0_i32_0 = arith.constant 0 : i32
    %c0_i32_1 = arith.constant 0 : i32
    return %arg0, %c0_i32, %c0_i32_0 : i32, i32, i32
  }
}

</mosaic_0001>

<bundles_post_ra>
// kernel: tpu_custom_call.1
= control target key start
LH: loop header
LB: loop body
LE: loop exit
PB: predicated region body
PF: predicated region fallthrough
CT: control target
= control target key end

     0   :  { %12 = vsyncpa [#allocation3], 0  ;;  %s702_s0 = inlined_call_operand.vmem [shape: s32[2,1], index: 0, kind: input, shape index: {}]   ;;  %s703_s1 = inlined_call_operand.hbm [shape: bf16[2,8,32], index: 1, kind: input, shape index: {}]   ;;  %s704_s2 = inlined_call_operand.hbm [shape: bf16[16,32], index: 2, kind: input, shape index: {}]   ;;  %s705_s3 = inlined_call_operand.hbm [shape: bf16[32,128], index: 3, kind: input, shape index: {}]   ;;  %s706_s4 = inlined_call_operand.vmem [shape: f32[1,128], index: 4, kind: input, shape index: {}]   ;;  %s707_s5 = inlined_call_operand.vmem [shape: bf16[32,128], index: 5, kind: input, shape index: {}]   ;;  %s708_s6 = inlined_call_operand.vmem [shape: f32[1,128], index: 6, kind: input, shape index: {}]   ;;  %s709_s7 = inlined_call_operand.hbm [shape: bf16[2,8,128], index: 7, kind: output, shape index: {}]  }
   0x1   :  { %13 = vsyncpa [#allocation6], 0 }
   0x2   :  { %14 = vsyncpa [#allocation4], 0  ;;  %s552_s24 = smov [#allocation5]   ;;  %s553_s26 = smov [#allocation2]  }
   0x3   :  { %s34_s25 = sshll.u32 %s552_s24, 4  ;;  %s22_s27 = sshll.u32 %s553_s26, 4  ;;  %s35_s25 = int_to_ptr.vmem [resolvable:$true] %s34_s25  ;;  %s602_s27 = int_to_ptr.vmem [resolvable:$true] %s22_s27 }
   0x4   :  { %s458_s30 = scalar_lea.hbm %s704_s2, 128 }
   0x5   :  { %p459_p0 = scmp.ne.s32.totalorder %s704_s2, %s458_s30  ;;  %p462_p1 = scmp.lt.u32.totalorder %s458_s30, %s704_s2 }
   0x7   :  { %p464_p2 = pnand %p462_p1, %p459_p0 }
   0x9   :  { %467 = shalt.err (!%p464_p2)
}
   0xa   :  { %s468_s12 = scalar_lea.vmem %s35_s25, 128  ;;  %p473_p4 = scmp.lt.s32.totalorder %s35_s25, %s35_s25 }
   0xb   :  { %p469_p3 = scmp.ne.s32.totalorder %s35_s25, %s468_s12  ;;  %p474_p5 = scmp.lt.s32.totalorder %s468_s12, %s468_s12 }
   0xd   :  { %p475_p6 = por %p474_p5, %p473_p4 }
   0xf   :  { %p476_p7 = pnand %p475_p6, %p469_p3 }
  0x11   :  { %479 = shalt.err (!%p476_p7)
}
  0x12   :  { %s554_s13 = smov 64   ;;  %s555_s14 = smov 4  }
  0x13   :  { %40 = dma.hbm_to_vmem [thread:$0]  %s704_s2, 128, %s35_s25, [#allocation6], %s554_s13, %s554_s13, %s555_s14  }
  0x14   :  { %s480_s19 = scalar_lea.hbm %s703_s1, 128 }
  0x15   :  { %p481_p8 = scmp.ne.s32.totalorder %s703_s1, %s480_s19  ;;  %p484_p9 = scmp.lt.u32.totalorder %s480_s19, %s703_s1 }
  0x17   :  { %p486_p10 = pnand %p484_p9, %p481_p8 }
  0x19   :  { %489 = shalt.err (!%p486_p10)
}
  0x1a   :  { %s490_s24 = scalar_lea.vmem %s602_s27, 128  ;;  %p495_p12 = scmp.lt.s32.totalorder %s602_s27, %s602_s27 }
  0x1b   :  { %p491_p11 = scmp.ne.s32.totalorder %s602_s27, %s490_s24  ;;  %p496_p13 = scmp.lt.s32.totalorder %s490_s24, %s490_s24 }
  0x1d   :  { %p497_p0 = por %p496_p13, %p495_p12 }
  0x1f   :  { %p498_p1 = pnand %p497_p0, %p491_p11 }
  0x21   :  { %501 = shalt.err (!%p498_p1)
}
  0x22   :  { %28 = dma.hbm_to_vmem [thread:$0]  %s703_s1, 128, %s602_s27, [#allocation3], %s554_s13, %s554_s13, %s555_s14  }
  0x23   :  { %s556_s26 = smov [#allocation7]   ;;  %s502_s8 = scalar_lea.hbm %s705_s3, 256 }
  0x24   :  { %s46_s28 = sshll.u32 %s556_s26, 4  ;;  %p503_p2 = scmp.ne.s32.totalorder %s705_s3, %s502_s8  ;;  %s47_s28 = int_to_ptr.vmem [resolvable:$true] %s46_s28 }
  0x25   :  { %p506_p3 = scmp.lt.u32.totalorder %s502_s8, %s705_s3 }
  0x27   :  { %p508_p4 = pnand %p506_p3, %p503_p2 }
  0x29   :  { %511 = shalt.err (!%p508_p4)
}
  0x2a   :  { %s512_s15 = scalar_lea.vmem %s47_s28, 256  ;;  %p517_p6 = scmp.lt.s32.totalorder %s47_s28, %s47_s28 }
  0x2b   :  { %p513_p5 = scmp.ne.s32.totalorder %s47_s28, %s512_s15  ;;  %p518_p7 = scmp.lt.s32.totalorder %s512_s15, %s512_s15 }
  0x2d   :  { %p519_p8 = por %p518_p7, %p517_p6 }
  0x2f   :  { %p520_p9 = pnand %p519_p8, %p513_p5 }
  0x31   :  { %523 = shalt.err (!%p520_p9)
}
  0x32   :  { %52 = dma.hbm_to_vmem [thread:$0]  %s705_s3, 256, %s47_s28, [#allocation6], %s554_s13, %s554_s13, %s555_s14  }
  0x33   :  { %546 = dma.done.wait [#allocation3], 128  }
  0x34   :  { %547 = vsyncadd [#allocation3], 4294967168 }
  0x35   :  { %548 = dma.done.wait [#allocation6], 384  }
  0x36   :  { %549 = vsyncadd [#allocation6], 4294966912  ;;  %v75_v0 = vlaneseq  ;;  %v557_v1 = vmov 0   ;;  %v558_v2 = vmov 1966171168   ;;  %v559_v5 = vmov 0.0  }
  0x37   :  { %440 = vset.pattern.permute.xlu1 %v557_v1  ;;  %439 = vset.pattern.permute.xlu0 %v557_v1  ;;  %v78_v3 = vunpack.c.l.s4 %v558_v2  ;;  %v69_v8 = vld [vmem:[%s702_s0] sm:$0x3]  ;;  %v442_v22 = vld [vmem:[#allocation7 + $0x8] sm:$0xff]   ;;  %vm560_vm3 = vmmov 0   ;;  %v445_v25 = vld [vmem:[#allocation5] sm:$0xff]   ;;  %vm125_vm4 = vcmask 261120  }
  0x38   :  { %v76_v4 = vshrl.u32 %v75_v0, 7  ;;  %413 = vmatprep.subr.bf16.mxu0 %v559_v5  ;;  %421 = vmatprep.subr.bf16.mxu1 %v559_v5  ;;  %v70_v10 = vcvt.s32.f32 %v69_v8  ;;  %vm72_vm0 = vcmp.gt.s32.totalorder %v69_v8, 0  ;;  %v441_v21 = vld [vmem:[#allocation7] sm:$0xff]   ;;  %v444_v24 = vld [vmem:[%s707_s5 + $0x8] sm:$0xff]   ;;  %v399_v26 = vld [vmem:[#allocation2] sm:$0xff]   ;;  %vm175_vm7 = vcmask 1041409  }
  0x39   :  { %v79_v6 = vunpack.c.0.s8 %v78_v3  ;;  %v388_v17 = vsel %vm72_vm0, 1.0, %v559_v5  ;;  %414 = vmatpush3.bf16.msra.mxu0 %v441_v21  ;;  %v443_v23 = vld [vmem:[%s707_s5] sm:$0xff]   ;;  %417 = vmatprep.mubr.msk.bf16.mxu0 %vm560_vm3, %v559_v5  ;;  %v401_v27 = vunpack.c.h.bf16 %v399_v26  ;;  %v400_v32 = vunpack.c.l.bf16 %v399_v26 }
  0x3a   :  { %v660_v11 = vsub.s32 0, %v76_v4  ;;  %v71_v13 = vmax.f32 %v70_v10, 1.0  ;;  %415 = vmatprep.subr.bf16.mxu0 %v559_v5  ;;  %425 = vmatprep.mubr.msk.bf16.mxu1 %vm560_vm3, %v559_v5  ;;  %v389_v0 = vld [vmem:[%s706_s4] ss:$0 sm:$0xff]  ;;  %s561_s4 = smov [#allocation8]  }
  0x3b   :  { %v654_v7 = vsub.s32 %v79_v6, %v76_v4  ;;  %422 = vmatpush3.bf16.msra.mxu1 %v443_v23 }
  0x3c   :  { %142 = vperm.xlu1 %440, %v71_v13   ;;  %423 = vmatprep.subr.bf16.mxu1 %v559_v5 }
  0x3d   :  { %v83_v9 = vrot.slane %v69_v8, %v654_v7  ;;  %416 = vmatpush3.bf16.msra.mxu0 %v442_v22 }
  0x3f   :  { %v84_v12 = vcombine.high %v83_v9, %v83_v9  ;;  %v91_v14 = vrot.slane %v83_v9, %v654_v7  ;;  %424 = vmatpush3.bf16.msra.mxu1 %v444_v24 }
  0x40   :  { %166 = vperm.xlu1 %440, %v388_v17  }
  0x41   :  { %v98_v15 = vrot.slane %v84_v12, %v654_v7  ;;  %v102_v16 = vrot.slane %v91_v14, %v660_v11 }
  0x42   :  { %426 = vmatmul.mubr.msk.bf16.vlgmr.msra.gmra.mrb[0].mxu1 %vm125_vm4, %v445_v25 }
  0x43   :  { %v106_v18 = vrot.slane %v98_v15, %v660_v11  ;;  %vm107_vm2 = vcmp.lt.s32.totalorder %v76_v4, %v102_v16  ;;  %v397_v15 = vld [vmem:[%s708_s6] ss:$0 sm:$0xff]  ;;  %s375_s6 = sshll.u32 %s561_s4, 4  ;;  %s376_s6 = int_to_ptr.vmem [resolvable:$true] %s375_s6 }
  0x44   :  { %v113_v20 = vsel %vm107_vm2, 1, %v557_v1  ;;  %s524_s23 = scalar_lea.vmem %s376_s6, 128  ;;  %p529_p11 = scmp.lt.s32.totalorder %s376_s6, %s376_s6 }
  0x45   :  { %vm108_vm1 = vcmp.lt.s32.totalorder %v76_v4, %v106_v18  ;;  %p525_p10 = scmp.ne.s32.totalorder %s376_s6, %s524_s23  ;;  %p530_p12 = scmp.lt.s32.totalorder %s524_s23, %s524_s23 }
  0x46   :  { %v114_v19 = vsel %vm108_vm1, 1, %v557_v1 }
  0x47   :  { %119 = vperm.xlu0 %439, %v114_v19   ;;  %p531_p13 = por %p530_p12, %p529_p11 }
  0x49   :  { %p532_p0 = pnand %p531_p13, %p525_p10 }
  0x4b   :  { %116 = vperm.xlu0 %439, %v113_v20  }
  0xbb   :  { %v143_v28 = vpop.permute.xlu1 %142 }
  0xbc   :  { %v144_v29 = vrot.slane %v143_v28, 1 }
  0xbe   :  { %446 = vrcp.f32 %v144_v29 }
  0xbf   :  { %448 = vrcp.f32 %v143_v28  ;;  %v167_v1 = vpop.permute.xlu1 %166 }
  0xc0   :  { %v169_v2 = vmul.f32 %v389_v0, %v167_v1 }
  0xc6   :  { %v120_v30 = vpop.permute.xlu0 %119 }
  0xc7   :  { %vm122_vm5 = vcmp.eq.s32.totalorder %v120_v30, 1 }
  0xc8   :  { %v124_v31 = vsel %vm122_vm5, %v401_v27, 0.0  ;;  %v447_v45 = vpop.eup %446 }
  0xc9   :  { %v133_v33 = vsel %vm125_vm4, %v124_v31, 0.0  ;;  %v449_v52 = vpop.eup %448 }
  0xca   :  { %v134_v34 = vrot.slane %v133_v33, 4  ;;  %v117_v35 = vpop.permute.xlu0 %116 }
  0xcb   :  { %vm121_vm6 = vcmp.eq.s32.totalorder %v117_v35, 1 }
  0xcc   :  { %v135_v36 = vadd.f32 %v134_v34, %v133_v33  ;;  %v123_v37 = vsel %vm121_vm6, %v400_v32, 0.0 }
  0xcd   :  { %v126_v38 = vsel %vm125_vm4, %v123_v37, 0.0 }
  0xce   :  { %v136_v39 = vrot.slane %v135_v36, 2  ;;  %v127_v40 = vrot.slane %v126_v38, 4 }
  0xd0   :  { %v137_v41 = vadd.f32 %v136_v39, %v135_v36  ;;  %v128_v42 = vadd.f32 %v127_v40, %v126_v38 }
  0xd2   :  { %v138_v43 = vrot.slane %v137_v41, 1  ;;  %v129_v44 = vrot.slane %v128_v42, 2 }
  0xd4   :  { %v139_v46 = vadd.f32 %v138_v43, %v137_v41  ;;  %v130_v47 = vadd.f32 %v129_v44, %v128_v42 }
  0xd6   :  { %v150_v48 = vmul.f32 %v447_v45, %v139_v46  ;;  %v131_v49 = vrot.slane %v130_v47, 1 }
  0xd8   :  { %v132_v50 = vadd.f32 %v131_v49, %v130_v47  ;;  %v152_v51 = vpack.c.bf16 %v150_v48, %v150_v48 }
  0xda   :  { %v148_v53 = vmul.f32 %v449_v52, %v132_v50  ;;  %v173_v54 = vunpack.c.l.b16 %v152_v51 }
  0xdc   :  { %v151_v55 = vpack.c.bf16 %v148_v53, %v148_v53  ;;  %v174_v57 = vrot.slane %v173_v54, 7 }
  0xde   :  { %v172_v56 = vunpack.c.l.b16 %v151_v55 }
  0xe0   :  { %v176_v58 = vsel %vm175_vm7, %v174_v57, %v172_v56 }
  0xe1   :  { %v177_v59 = vpack.c.b16 %v176_v58, %v176_v58 }
  0xe3   :  { %418 = vmatmul.mubr.msk.bf16.vlgmr.msra.gmra.mrb[0].mxu0 %vm125_vm4, %v177_v59 }
 0x115   :  { %v293_v60 = vpop.f32.mrb[0].mxu1 }
 0x116   :  { %v427_v61 = vpop.f32.mrb[1].mxu1 }
 0x117   :  { %v296_v62 = vpop.f32.mrb[2].mxu1 }
 0x118   :  { %v428_v63 = vpop.f32.mrb[3].mxu1 }
 0x1b6   :  { %v227_v3 = vpop.f32.mrb[0].mxu0 }
 0x1b7   :  { %v228_v4 = vadd.f32 %v227_v3, %v169_v2  ;;  %v419_v5 = vpop.f32.mrb[1].mxu0 }
 0x1b8   :  { %v230_v6 = vpop.f32.mrb[2].mxu0 }
 0x1b9   :  { %v307_v8 = vrot.slane %v228_v4, %v654_v7  ;;  %v420_v9 = vpop.f32.mrb[3].mxu0 }
 0x1bb   :  { %v308_v10 = vcombine.high %v307_v8, %v307_v8  ;;  %v315_v12 = vrot.slane %v307_v8, %v654_v7 }
 0x1bd   :  { %v326_v13 = vrot.slane %v315_v12, %v660_v11  ;;  %v322_v14 = vrot.slane %v308_v10, %v654_v7 }
 0x1bf   :  { %v333_v16 = vadd.f32 %v326_v13, %v293_v60  ;;  %v330_v17 = vrot.slane %v322_v14, %v660_v11 }
 0x1c1   :  { %v342_v18 = vadd.f32 %v397_v15, %v333_v16  ;;  %v334_v19 = vadd.f32 %v330_v17, %v296_v62 }
 0x1c3   :  { %v343_v20 = vadd.f32 %v397_v15, %v334_v19  ;;  %344 = vmax.xlane.f32.xlu0 %v342_v18 }
 0x1c5   :  { %346 = vmax.xlane.f32.xlu1 %v343_v20 }
 0x250   :  { %v345_v21 = vpop.xlane.xlu0 %344 }
 0x251   :  { %v348_v22 = vsub.f32 %v342_v18, %v345_v21 }
 0x252   :  { %v347_v23 = vpop.xlane.xlu1 %346 }
 0x253   :  { %v350_v24 = vmul.f32 1.442695, %v348_v22  ;;  %v349_v25 = vsub.f32 %v343_v20, %v347_v23 }
 0x255   :  { %450 = vpow2.f32 %v350_v24  ;;  %v352_v26 = vmul.f32 1.442695, %v349_v25 }
 0x257   :  { %452 = vpow2.f32 %v352_v26 }
 0x25f   :  { %v451_v7 = vpop.eup %450 }
 0x260   :  { %354 = vadd.xlane.f32.xlu0 %v451_v7 }
 0x261   :  { %v453_v27 = vpop.eup %452 }
 0x264   :  { %356 = vadd.xlane.f32.xlu0 %v453_v27 }
 0x2ed   :  { %v355_v28 = vpop.xlane.xlu0 %354 }
 0x2ee   :  { %454 = vlog2.f32 %v355_v28 }
 0x2f1   :  { %v357_v11 = vpop.xlane.xlu0 %356 }
 0x2f2   :  { %456 = vlog2.f32 %v357_v11 }
 0x2f8   :  { %v455_v29 = vpop.eup %454 }
 0x2f9   :  { %v359_v30 = vmul.f32 0.6931472, %v455_v29 }
 0x2fb   :  { %v362_v32 = vadd.f32 %v359_v30, %v345_v21 }
 0x2fc   :  { %v457_v31 = vpop.eup %456 }
 0x2fd   :  { %v361_v33 = vmul.f32 0.6931472, %v457_v31  ;;  %v364_v35 = vsub.f32 %v342_v18, %v362_v32 }
 0x2ff   :  { %v363_v34 = vadd.f32 %v361_v33, %v347_v23 }
 0x301   :  { %v365_v36 = vsub.f32 %v343_v20, %v363_v34 }
 0x303   :  { %v405_v37 = vpack.c.bf16 %v365_v36, %v364_v35 }
 0x305   :  { %406 = vst [vmem:[#allocation8] sm:$0xff] %v405_v37  }
 0x306   :  { %535 = shalt.err (!%p532_p0)
}
 0x307   :  { %s536_s25 = scalar_lea.hbm %s709_s7, 128 }
 0x308   :  { %p537_p1 = scmp.ne.s32.totalorder %s709_s7, %s536_s25  ;;  %p540_p2 = scmp.lt.u32.totalorder %s536_s25, %s709_s7 }
 0x30a   :  { %p542_p3 = pnand %p540_p2, %p537_p1 }
 0x30c   :  { %545 = shalt.err (!%p542_p3)
}
 0x30d   :  { %381 = dma.vmem_to_hbm [thread:$0]  %s376_s6, 128, %s709_s7, [#allocation4], %s554_s13, %s554_s13, %s555_s14  }
 0x30e   :  { %550 = dma.done.wait [#allocation4], 128  }
 0x30f   :  { %551 = vsyncadd [#allocation4], 4294967168 }
 0x310   :  { %385 = vsyncpa [#allocation3], 1 }
 0x311   :  { %386 = vsyncpa [#allocation6], 1 }
 0x312   :  { %387 = vsyncpa [#allocation4], 1 }

</bundles_post_ra>
